<compile_context>
chip_gen: v6e
topology: v6e:2x2x1
jax: 0.10.0
libtpu: 0.0.40
codegen_flags: <defaults>
</compile_context>

<pallas_src>
import functools

import jax
import jax.numpy as jnp
from jax.experimental import pallas as pl
from jax.experimental.pallas import tpu as pltpu


def _round_up(x, m):
    return ((x + m - 1) // m) * m


def _choose_tm(M):
    """Lane-tile width for the M (= N*H_out*W_out) axis.

    Prefer large tiles (per-step overhead ~0.35 us dominates small tiles) but
    keep >= 2 grid tiles when the problem allows it so both v7x TensorCores
    get work.  Cap at 4096 lanes (32 lane-blocks) per tile.
    """
    n_lanes = pl.cdiv(M, 128)
    if n_lanes <= 1:
        blocks = 1
    else:
        blocks = min(32, pl.cdiv(n_lanes, 2))
    return blocks * 128


def _wt_matmul_bias_kernel(w_ref, b_ref, p_ref, o_ref):
    """out^T tile = W @ patches^T tile + bias, f32 accumulation on the MXU.

    w_ref: (Cp, Kc8)  bf16 flattened conv weights (whole array, resident)
    b_ref: (Cp, 1)    f32 bias column (broadcast over lanes)
    p_ref: (Kc8, tm)  bf16 im2col patch tile, M on lanes
    o_ref: (Cp, tm)   f32 output tile, lane-dense in M
    """
    acc = jnp.dot(w_ref[...], p_ref[...], preferred_element_type=jnp.float32)
    o_ref[...] = (acc + b_ref[...]).astype(o_ref.dtype)


def conv_layer_forward(x, weight, bias, *, kernel_size, stride):
    """ReflectionPad2d(floor(K/2)) followed by Conv2d(K, stride). NCHW in/out."""
    N, C_in, H, W = x.shape
    C_out, C_in_w, K, K2 = weight.shape
    assert C_in == C_in_w and K == kernel_size and K2 == kernel_size

    p = K // 2
    if p > 0 and (p >= H or p >= W):
        # Same constraint as nn.ReflectionPad2d: pad must be < spatial dim.
        raise ValueError(f"reflection pad {p} requires H,W > {p}, got {H}x{W}")

    # --- wrapper-side glue: reflection pad + im2col, built directly in the
    # transposed (Kc, M) layout and in bf16 so the patch matrix is written to
    # HBM exactly once at half width.
    x_bf = x.astype(jnp.bfloat16)
    xp = jnp.pad(x_bf, ((0, 0), (0, 0), (p, p), (p, p)), mode="reflect")
    Hp, Wp = H + 2 * p, W + 2 * p
    H_out = (Hp - K) // stride + 1
    W_out = (Wp - K) // stride + 1

    x_cn = jnp.transpose(xp, (1, 0, 2, 3))  # (C_in, N, Hp, Wp)

    taps = []
    for kh in range(K):
        for kw in range(K):
            taps.append(
                x_cn[
                    :,
                    :,
                    kh : kh + stride * (H_out - 1) + 1 : stride,
                    kw : kw + stride * (W_out - 1) + 1 : stride,
                ]
            )
    Kc = C_in * K * K
    M = N * H_out * W_out
    # (C_in, K*K, N, H_out, W_out) -> (Kc, M); Kc order = (c_in, kh, kw),
    # matching weight.reshape(C_out, Kc). M order = (n, h_out, w_out).
    patches_t = jnp.stack(taps, axis=1).reshape(Kc, M)

    # Minimal padding: contraction to a multiple of 8 (sublane), M to the tile.
    Kc8 = _round_up(Kc, 8)
    Cp = _round_up(C_out, 8)
    tm = _choose_tm(M)
    M_pad = _round_up(M, tm)
    patches_t = jnp.pad(patches_t, ((0, Kc8 - Kc), (0, M_pad - M)))

    w_p = jnp.zeros((Cp, Kc8), jnp.bfloat16)
    w_p = w_p.at[:C_out, :Kc].set(weight.reshape(C_out, Kc).astype(jnp.bfloat16))
    b_p = jnp.zeros((Cp, 1), jnp.float32)
    b_p = b_p.at[:C_out, 0].set(bias.astype(jnp.float32))

    grid = (M_pad // tm,)

    # Real (unpadded) work for XLA's scheduler.
    cost = pl.CostEstimate(
        flops=2 * M * Kc * C_out,
        transcendentals=0,
        bytes_accessed=M * Kc * 2 + C_out * Kc * 2 + C_out * 4 + M * C_out * 4,
    )

    out_t = pl.pallas_call(
        _wt_matmul_bias_kernel,
        out_shape=jax.ShapeDtypeStruct((Cp, M_pad), jnp.float32),
        grid=grid,
        in_specs=[
            pl.BlockSpec((Cp, Kc8), lambda i: (0, 0)),  # weights, resident
            pl.BlockSpec((Cp, 1), lambda i: (0, 0)),    # bias, resident
            pl.BlockSpec((Kc8, tm), lambda i: (0, i)),  # streaming patches
        ],
        out_specs=pl.BlockSpec((Cp, tm), lambda i: (0, i)),
        compiler_params=pltpu.CompilerParams(
            dimension_semantics=("parallel",),
            vmem_limit_bytes=32 * 1024 * 1024,
        ),
        cost_estimate=cost,
    )(w_p, b_p, patches_t)

    # (C_out, M) -> (C_out, N, H_out, W_out) -> NCHW; only the tiny output
    # moves here (no full-tensor layout pass).
    out = out_t[:C_out, :M].reshape(C_out, N, H_out, W_out)
    return jnp.transpose(out, (1, 0, 2, 3)).astype(x.dtype)


if __name__ == "__main__":
    # ConvLayer(in_channels=4, out_channels=8, kernel_size=3, stride=2)
    in_channels, out_channels, kernel_size, stride = 4, 8, 3, 2
    N, H, W = 2, 16, 16

    key = jax.random.PRNGKey(0)
    k_x, k_w, k_b = jax.random.split(key, 3)

    x = jax.random.normal(k_x, (N, in_channels, H, W), dtype=jnp.float32)

    # Deterministic PyTorch-Conv2d-style uniform init with bound 1/sqrt(fan_in).
    fan_in = in_channels * kernel_size * kernel_size
    bound = 1.0 / jnp.sqrt(jnp.float32(fan_in))
    weight = jax.random.uniform(
        k_w,
        (out_channels, in_channels, kernel_size, kernel_size),
        minval=-bound,
        maxval=bound,
        dtype=jnp.float32,
    )
    bias = jax.random.uniform(
        k_b, (out_channels,), minval=-bound, maxval=bound, dtype=jnp.float32
    )

    conv_fn = jax.jit(
        functools.partial(
            conv_layer_forward, kernel_size=kernel_size, stride=stride
        )
    )
    out = conv_fn(x, weight, bias)
    out = jax.block_until_ready(out)

    # Pure-JAX f32 reference (reflection pad + VALID conv).
    p = kernel_size // 2
    xp = jnp.pad(x, ((0, 0), (0, 0), (p, p), (p, p)), mode="reflect")
    ref = jax.lax.conv_general_dilated(
        xp,
        weight,
        window_strides=(stride, stride),
        padding="VALID",
        dimension_numbers=("NCHW", "OIHW", "NCHW"),
    ) + bias[None, :, None, None]

    assert out.shape == ref.shape, (out.shape, ref.shape)
    # Kernel uses bf16 matmul operands (f32 accumulation) -> looser tolerance.
    assert jnp.allclose(out, ref, atol=5e-2, rtol=5e-2), float(
        jnp.max(jnp.abs(out - ref))
    )
    print("KERNEL_OK")
</pallas_src>

<mosaic_0001>
module attributes {stable_mosaic.version = 11 : i64} {
  func.func @_wt_matmul_bias_kernel(%arg0: i32, %arg1: memref<8x40xbf16, #tpu.memory_space<vmem>>, %arg2: memref<8x1xf32, #tpu.memory_space<vmem>>, %arg3: memref<40x128xbf16, #tpu.memory_space<vmem>>, %arg4: memref<8x128xf32, #tpu.memory_space<vmem>>) attributes {dimension_semantics = [#tpu.dimension_semantics<parallel>], iteration_bounds = array<i64: 1>, scalar_prefetch = 0 : i64, scratch_operands = 0 : i64, tpu.core_type = #tpu.core_type<tc>, window_params = [{pipeline_mode = #tpu.pipeline_mode<synchronous>, transform_indices = @transform_0, window_bounds = array<i64: 8, 40>}, {pipeline_mode = #tpu.pipeline_mode<synchronous>, transform_indices = @transform_1, window_bounds = array<i64: 8, 1>}, {transform_indices = @transform_2, window_bounds = array<i64: 40, 128>}, {transform_indices = @transform_3, window_bounds = array<i64: 8, 128>}]} {
    %c0 = arith.constant 0 : index
    %c0_0 = arith.constant 0 : index
    %0 = vector.load %arg1[%c0, %c0_0] : memref<8x40xbf16, #tpu.memory_space<vmem>>, vector<8x40xbf16>
    %c0_1 = arith.constant 0 : index
    %c0_2 = arith.constant 0 : index
    %1 = vector.load %arg3[%c0_1, %c0_2] : memref<40x128xbf16, #tpu.memory_space<vmem>>, vector<40x128xbf16>
    %cst = arith.constant dense<0.000000e+00> : vector<8x128xf32>
    %2 = tpu.matmul %0, %1, %cst {dimension_numbers = #tpu.dot_dimension_numbers<[1], [0], [0], [1], [0, 0, 1, 1], [], []>} : vector<8x40xbf16>, vector<40x128xbf16>, vector<8x128xf32> -> vector<8x128xf32>
    %c0_3 = arith.constant 0 : index
    %c0_4 = arith.constant 0 : index
    %3 = vector.load %arg2[%c0_3, %c0_4] : memref<8x1xf32, #tpu.memory_space<vmem>>, vector<8x1xf32>
    %4 = vector.broadcast %3 : vector<8x1xf32> to vector<8x128xf32>
    %5 = arith.addf %2, %4 : vector<8x128xf32>
    %c0_5 = arith.constant 0 : index
    %c0_6 = arith.constant 0 : index
    %6 = vector.load %arg4[%c0_5, %c0_6] : memref<8x128xf32, #tpu.memory_space<vmem>>, vector<8x128xf32>
    tpu.vector_store %arg4[%c0_5, %c0_6], %5 {strides = array<i32>} : memref<8x128xf32, #tpu.memory_space<vmem>>, vector<8x128xf32>,
    return
  }
  func.func @transform_0(%arg0: i32) -> (i32, i32) {
    %c0_i32 = arith.constant 0 : i32
    %c0_i32_0 = arith.constant 0 : i32
    %c0_i32_1 = arith.constant 0 : i32
    return %c0_i32, %c0_i32_0 : i32, i32
  }
  func.func @transform_1(%arg0: i32) -> (i32, i32) {
    %c0_i32 = arith.constant 0 : i32
    %c0_i32_0 = arith.constant 0 : i32
    %c0_i32_1 = arith.constant 0 : i32
    return %c0_i32, %c0_i32_0 : i32, i32
  }
  func.func @transform_2(%arg0: i32) -> (i32, i32) {
    %c0_i32 = arith.constant 0 : i32
    %c0_i32_0 = arith.constant 0 : i32
    return %c0_i32, %arg0 : i32, i32
  }
  func.func @transform_3(%arg0: i32) -> (i32, i32) {
    %c0_i32 = arith.constant 0 : i32
    %c0_i32_0 = arith.constant 0 : i32
    return %c0_i32, %arg0 : i32, i32
  }
}

</mosaic_0001>

<bundles_post_ra>
// kernel: conv_layer_forward.1
= control target key start
LH: loop header
LB: loop body
LE: loop exit
PB: predicated region body
PF: predicated region fallthrough
CT: control target
= control target key end

     0   :  { %vm46_vm0 = vcmask 1043456   ;;  %v120_v0 = vmov 0.0   ;;  %vm121_vm1 = vmmov 0   ;;  %v122_v3 = vmov 0   ;;  %s161_s2 = inlined_call_operand.vmem [shape: bf16[40,128], index: 2, kind: input, shape index: {}]   ;;  %s162_s1 = inlined_call_operand.vmem [shape: f32[8,1], index: 1, kind: input, shape index: {}]   ;;  %s163_s0 = inlined_call_operand.vmem [shape: bf16[8,40], index: 0, kind: input, shape index: {}]   ;;  %s164_s3 = inlined_call_operand.vmem [shape: f32[8,128], index: 3, kind: output, shape index: {}]  }
   0x1   :  { %103 = vmatprep.subr.bf16.mxu0 %v120_v0  ;;  %v117_v1 = vld [vmem:[%s161_s2 + $0x10] ss:$0 sps:$4 sm:$0xff]   ;;  %109 = vmatprep.mubr.msk.bf16.mxu0 %vm121_vm1, %v120_v0  ;;  %v118_v4 = vld [vmem:[%s161_s2 + $0x8] sm:$0xff]   ;;  %v21_v5 = vld [vmem:[%s162_s1] sm:$0xff]  ;;  %vm42_vm2 = vcmask 326656  }
   0x2   :  { %v48_v2 = vsel %vm46_vm0, %v117_v1, 0  ;;  %116 = vset.pattern.permute.xlu0 %v122_v3  ;;  %v119_v6 = vld [vmem:[%s161_s2] sm:$0xff]  }
   0x3   :  { %104 = vmatpush3.bf16.msra.mxu0 %v48_v2  ;;  %24 = vperm.xlu0 %116, %v21_v5   ;;  %v15_v7 = vld [vmem:[%s163_s0] sm:$0xf] }
   0x4   :  { %105 = vmatprep.subr.bf16.mxu0 %v120_v0 }
   0x7   :  { %106 = vmatpush3.bf16.msra.mxu0 %v118_v4 }
   0x8   :  { %107 = vmatprep.subr.bf16.mxu0 %v120_v0 }
   0xb   :  { %108 = vmatpush3.bf16.msra.mxu0 %v119_v6 }
   0xe   :  { %110 = vmatmul.mubr.msk.bf16.vlgmr.msra.gmra.mxu0 %vm42_vm2, %v15_v7 }
  0x7e   :  { %v25_v8 = vpop.permute.xlu0 %24 }
  0xce   :  { %v84_v9 = vpop.f32.mrf.mxu0 }
  0xcf   :  { %v85_v10 = vadd.f32 %v84_v9, %v25_v8 }
  0xd0   :  { %v111_v11 = vpop.f32.mrf.mxu0 }
  0xd1   :  { %90 = vst [vmem:[%s164_s3] sm:$0xff] %v85_v10 }
  0xd2   :  { %v87_v12 = vpop.f32.mrf.mxu0 }
  0xd4   :  { %v112_v13 = vpop.f32.mrf.mxu0 }

</bundles_post_ra>
